<compile_context>
chip_gen: v7x
topology: tpu7x:2x2x1
jax: 0.10.0
libtpu: 0.0.40
codegen_flags: <defaults>
</compile_context>

<pallas_src>
import math
from functools import partial
from typing import NamedTuple

import jax
import jax.numpy as jnp
import numpy as np
from jax.experimental import pallas as pl
from jax.experimental.pallas import tpu as pltpu


# --------------------------------------------------------------------------
# One-time SGRU weight preparation (hoisted out of the hot path).
# --------------------------------------------------------------------------
class MergeParams(NamedTuple):
    wr_x: jax.Array   # (Dp, 2*Dp) bf16  -- x-part of r-gates (rx, rh)
    wr_h: jax.Array   # (Dp, 2*Dp) bf16  -- h-part of r-gates
    br:   jax.Array   # (1, 2*Dp)  f32
    wz_x: jax.Array   # (Dp, 3*Dp) bf16  -- x-part of z-gates
    wz_h: jax.Array   # (Dp, 3*Dp) bf16  -- h-part of z-gates
    bz:   jax.Array   # (1, 3*Dp)  f32
    ux:   jax.Array   # (Dp, Dp)   bf16
    uh:   jax.Array   # (Dp, Dp)   bf16
    bu:   jax.Array   # (1, Dp)    f32


def prepare_merge_params(Wt, bW, Ut, bU):
    """Pad each gate panel of the SGRU weights to 128-lane boundaries and cast
    to bf16.  Call ONCE at parameter-setup time — NOT inside the per-step
    forward — so the hot path never re-pads / re-casts weights."""
    twoD = Wt.shape[0]
    D = twoD // 2
    Dp = ((D + 127) // 128) * 128
    pad_d = Dp - D

    def pad_panels(w, n):                          # (D, n*D) -> (Dp, n*Dp) bf16
        w = w.reshape(D, n, D)
        w = jnp.pad(w, ((0, pad_d), (0, 0), (0, pad_d)))
        return w.reshape(Dp, n * Dp).astype(jnp.bfloat16)

    def pad_bias(b, n):                            # (1, n*D) -> (1, n*Dp) f32
        b = b.reshape(n, D)
        b = jnp.pad(b, ((0, 0), (0, pad_d)))
        return b.reshape(1, n * Dp).astype(jnp.float32)

    Wr = Wt[:, :2 * D]            # columns for gates 0,1  (rx, rh)
    Wz = Wt[:, 2 * D:]            # columns for gates 2,3,4 (z-softmax)
    return MergeParams(
        wr_x=pad_panels(Wr[:D], 2), wr_h=pad_panels(Wr[D:], 2),
        br=pad_bias(bW[:, :2 * D], 2),
        wz_x=pad_panels(Wz[:D], 3), wz_h=pad_panels(Wz[D:], 3),
        bz=pad_bias(bW[:, 2 * D:], 3),
        ux=pad_panels(Ut[:D], 1), uh=pad_panels(Ut[D:], 1),
        bu=pad_bias(bU, 1))


# --------------------------------------------------------------------------
# Pallas kernel: align_inputs (einsum bsd,bmzd->bsmz + masked softmax +
# einsum bsmz,bmzd->bsd) fused with the SGRUCell merge.
# --------------------------------------------------------------------------
def _align_merge_kernel(x_ref, sup_ref, bias_ref,
                        wrx_ref, wrh_ref, br_ref,
                        wzx_ref, wzh_ref, bz_ref,
                        ux_ref, uh_ref, bu_ref,
                        out_ref, *, inv_sqrt_d):
    Bb, S, Dp = x_ref.shape

    h3 = x_ref[...]                                      # (Bb, S, Dp)   f32
    sup = sup_ref[...]                                   # (Bb, MZp, Dp) bf16

    # ---- attention: logits -> masked softmax -> weighted sum over memory ----
    logits = jnp.einsum('bsd,bkd->bsk', h3.astype(jnp.bfloat16), sup,
                        preferred_element_type=jnp.float32)   # (Bb, S, MZp)
    # Scale BEFORE adding the (finite) -1e9 mask bias so the bias margin does
    # not shrink with D; masked / MZ-padding entries underflow to 0 after exp.
    logits = logits * jnp.float32(inv_sqrt_d) + bias_ref[...]
    logits = logits - jnp.max(logits, axis=-1, keepdims=True)
    e = jnp.exp(logits)
    att = e * pl.reciprocal(jnp.sum(e, axis=-1, keepdims=True), approx=True)

    summ = jnp.einsum('bsk,bkd->bsd', att.astype(jnp.bfloat16), sup,
                      preferred_element_type=jnp.float32)     # (Bb, S, Dp)

    # ---------------- SGRUCell: merge_x(summ, x_enc_base) -------------------
    x = summ.reshape(Bb * S, Dp)                         # SGRU "x"
    h = h3.reshape(Bb * S, Dp)                           # SGRU "h"
    xb = x.astype(jnp.bfloat16)
    hb = h.astype(jnp.bfloat16)

    # r-panel (gates 0,1), concat-free, consumed immediately -> short-lived.
    r = (jnp.dot(xb, wrx_ref[...], preferred_element_type=jnp.float32)
         + jnp.dot(hb, wrh_ref[...], preferred_element_type=jnp.float32)
         + br_ref[...])                                  # (Bb*S, 2*Dp)
    rx = jax.nn.sigmoid(r[:, 0 * Dp:1 * Dp])             # 128-lane aligned
    rh = jax.nn.sigmoid(r[:, 1 * Dp:2 * Dp])

    # u = tanh([x*rx, h*rh] @ Ut + bU), concat-free.
    u = jnp.tanh(
        jnp.dot((x * rx).astype(jnp.bfloat16), ux_ref[...],
                preferred_element_type=jnp.float32)
        + jnp.dot((h * rh).astype(jnp.bfloat16), uh_ref[...],
                  preferred_element_type=jnp.float32)
        + bu_ref[...])                                   # (Bb*S, Dp)

    # z-panel (gates 2,3,4): softmax over the 3 stacked z-gates.
    z = (jnp.dot(xb, wzx_ref[...], preferred_element_type=jnp.float32)
         + jnp.dot(hb, wzh_ref[...], preferred_element_type=jnp.float32)
         + bz_ref[...])                                  # (Bb*S, 3*Dp)
    g2 = z[:, 0 * Dp:1 * Dp]
    g3 = z[:, 1 * Dp:2 * Dp]
    g4 = z[:, 2 * Dp:3 * Dp]
    mg = jnp.maximum(jnp.maximum(g2, g3), g4)
    # TODO(synk): if a bundle dump shows the EUP slot binding at scale, cut to
    #             2 exps here by exploiting exp(g_max - mg) == 1.
    e2 = jnp.exp(g2 - mg)
    e3 = jnp.exp(g3 - mg)
    e4 = jnp.exp(g4 - mg)
    inv_zs = pl.reciprocal(e2 + e3 + e4, approx=True)

    h_new = x * (e2 * inv_zs) + h * (e3 * inv_zs) + u * (e4 * inv_zs)
    out_ref[...] = h_new.reshape(Bb, S, Dp).astype(out_ref.dtype)


# --------------------------------------------------------------------------
# Grid / tile selection and the pallas_call wrapper.
# --------------------------------------------------------------------------
def _pick_tiles(B, S, *, min_rows=256, s_cap=256):
    """Choose (b_tile, s_tile) for the (batch, seq) grid.

    Small problems (B*S <= 2*min_rows rows) run as one fat step: splitting
    them only starves the MXU and doubles weight DMA on megacore parts.
    Larger problems tile S (weights stay VMEM-resident; activation tiles get
    double-buffered) and split the batch only while each step still carries
    >= min_rows rows.
    """
    if B * S <= 2 * min_rows:
        return B, S
    s_tile = S
    if S > s_cap:
        t = (s_cap // 8) * 8
        while t >= 8:
            if S % t == 0:
                s_tile = t
                break
            t -= 8
    if s_tile >= min_rows:
        b_tile = 1
    else:
        target_b = -(-min_rows // s_tile)          # ceil
        b_tile = B
        for cand in range(target_b, B + 1):
            if B % cand == 0:
                b_tile = cand
                break
    return b_tile, s_tile


def align_and_merge(x_enc_base, xsup_enc, supmask_f, mp: MergeParams,
                    *, out_dtype=jnp.float32, b_tile=None, s_tile=None):
    B, S, D = x_enc_base.shape
    _, M, Z, _ = xsup_enc.shape
    MZ = M * Z
    Dp = mp.ux.shape[0]                          # lane-dense embedding dim
    pad_d = Dp - D
    MZp = ((MZ + 127) // 128) * 128              # lane-dense memory axis

    # ---- per-call activation layout prep (cheap XLA ops, not in-kernel) ----
    x_p = jnp.pad(x_enc_base, ((0, 0), (0, 0), (0, pad_d)))
    sup_p = jnp.pad(xsup_enc.reshape(B, MZ, D).astype(jnp.bfloat16),
                    ((0, 0), (0, MZp - MZ), (0, pad_d)))
    # additive mask bias: 0 where valid, -1e9 where masked or MZ-padding
    valid = jnp.pad(supmask_f.reshape(B, MZ) > 0, ((0, 0), (0, MZp - MZ)))
    bias = jnp.where(valid, jnp.float32(0.0),
                     jnp.float32(-1e9)).reshape(B, 1, MZp)

    if b_tile is None or s_tile is None:
        bt, st = _pick_tiles(B, S)
        b_tile = bt if b_tile is None else b_tile
        s_tile = st if s_tile is None else s_tile

    # ---- cost estimate (lets XLA schedule surrounding ops around the call) --
    rows = B * S
    out_itemsize = jnp.dtype(out_dtype).itemsize
    weight_bytes = sum(int(np.prod(w.shape)) * jnp.dtype(w.dtype).itemsize
                       for w in mp)
    flops = (4 * rows * MZp * Dp                    # two attention einsums
             + 2 * rows * Dp * (2 * Dp) * 2         # r-gates (x & h panels)
             + 2 * rows * Dp * (3 * Dp) * 2         # z-gates
             + 2 * rows * Dp * Dp * 2)              # u
    transcendentals = rows * (MZp + 8 * Dp)
    bytes_accessed = (x_p.size * 4 + sup_p.size * 2 + bias.size * 4
                      + rows * Dp * out_itemsize + weight_bytes)
    cost = pl.CostEstimate(flops=flops, transcendentals=transcendentals,
                           bytes_accessed=bytes_accessed)

    # ---- explicit VMEM budget (double-buffered tiles + resident weights +
    # compiler-managed intermediates), clamped well below v7x's 64 MiB. ------
    act_step = (b_tile * s_tile * Dp * 4            # x tile (f32)
                + b_tile * MZp * Dp * 2             # sup tile (bf16)
                + b_tile * MZp * 4                  # bias tile
                + b_tile * s_tile * Dp * out_itemsize)
    inter_step = b_tile * s_tile * (2 * MZp + 8 * Dp) * 4
    vmem_limit = int(min(48 << 20,
                         max(16 << 20,
                             2 * act_step + weight_bytes + inter_step
                             + (4 << 20))))

    out = pl.pallas_call(
        partial(_align_merge_kernel, inv_sqrt_d=1.0 / math.sqrt(D)),
        out_shape=jax.ShapeDtypeStruct((B, S, Dp), out_dtype),
        grid=(B // b_tile, S // s_tile),
        in_specs=[
            pl.BlockSpec((b_tile, s_tile, Dp), lambda b, s: (b, s, 0)),  # x
            pl.BlockSpec((b_tile, MZp, Dp),    lambda b, s: (b, 0, 0)),  # sup
            pl.BlockSpec((b_tile, 1, MZp),     lambda b, s: (b, 0, 0)),  # bias
            # weights: constant index_map -> VMEM-resident across grid steps
            pl.BlockSpec((Dp, 2 * Dp), lambda b, s: (0, 0)),             # Wr_x
            pl.BlockSpec((Dp, 2 * Dp), lambda b, s: (0, 0)),             # Wr_h
            pl.BlockSpec((1, 2 * Dp),  lambda b, s: (0, 0)),             # br
            pl.BlockSpec((Dp, 3 * Dp), lambda b, s: (0, 0)),             # Wz_x
            pl.BlockSpec((Dp, 3 * Dp), lambda b, s: (0, 0)),             # Wz_h
            pl.BlockSpec((1, 3 * Dp),  lambda b, s: (0, 0)),             # bz
            pl.BlockSpec((Dp, Dp),     lambda b, s: (0, 0)),             # Ux
            pl.BlockSpec((Dp, Dp),     lambda b, s: (0, 0)),             # Uh
            pl.BlockSpec((1, Dp),      lambda b, s: (0, 0)),             # bU
        ],
        out_specs=pl.BlockSpec((b_tile, s_tile, Dp), lambda b, s: (b, s, 0)),
        compiler_params=pltpu.CompilerParams(
            dimension_semantics=("parallel", "parallel"),
            vmem_limit_bytes=vmem_limit),
        cost_estimate=cost,
    )(x_p, sup_p, bias, mp.wr_x, mp.wr_h, mp.br,
      mp.wz_x, mp.wz_h, mp.bz, mp.ux, mp.uh, mp.bu)

    if pad_d:
        # TODO(synk): if production D is already a multiple of 128 this slice
        #             (an extra HBM pass over the output) disappears entirely.
        out = out[:, :, :D]
    return out


# --------------------------------------------------------------------------
# Deterministic stand-ins for the abstract submodules (plain JAX glue).
# --------------------------------------------------------------------------
def encode_tokens(tokens, mask, emb):
    # encoder / memory_encoder stand-in: embedding lookup, masked
    return emb[tokens] * mask.astype(jnp.float32)[..., None]


def memory_decoder_stub(start, y, ctx, ctxmask, emb_out):
    # InnerDecoder stand-in: out-embedding + pooled input context
    cf = ctxmask.astype(jnp.float32)
    pooled = (ctx * cf[..., None]).sum(1) / jnp.maximum(
        cf.sum(1, keepdims=True), 1.0)                       # (BM, D)
    return emb_out[y] + pooled[:, None, :] + emb_out[start][:, None, :]


def decoder_stub(x_enc, starttokens, y_in, memids, memencs, xmask, memmask,
                 emb_out):
    # DecoderWithMemory stand-in: attend decoder states over memory outputs
    B, T = y_in.shape
    D = x_enc.shape[-1]
    xf = xmask.astype(jnp.float32)
    ctx = (x_enc * xf[..., None]).sum(1) / jnp.maximum(
        xf.sum(1, keepdims=True), 1.0)                       # (B, D)
    dec = emb_out[y_in] + emb_out[starttokens][:, None, :] + ctx[:, None, :]
    mem = memencs.reshape(B, -1, D)                          # (B, M*(Ly-1), D)
    mm = memmask.reshape(B, -1)                              # (B, M*(Ly-1))
    w = jnp.einsum('btd,bkd->btk', dec, mem) / jnp.sqrt(jnp.float32(D))
    w = w + jnp.log(jnp.maximum(mm, 1e-9))[:, None, :]
    a = jax.nn.softmax(w, -1)
    summ = jnp.einsum('btk,bkd->btd', a, mem)
    out = jnp.einsum('btd,vd->btv', dec + summ, emb_out)     # (B, T, V)
    pred = jnp.argmax(out, -1)
    return out, pred


# --------------------------------------------------------------------------
# MetaSeqMemNN forward
# --------------------------------------------------------------------------
def meta_seq_mem_nn_forward(params, x, y, xsup, ysup, supmask):
    emb_in, emb_out, merge_params = params
    B, M, Z = xsup.shape
    Ly = ysup.shape[-1]
    D = emb_in.shape[-1]

    xsup_f = xsup.reshape(-1, Z)
    ysup_f = ysup.reshape(-1, Ly)
    xsup_mask = xsup_f != 0
    ysup_mask = ysup_f != 0

    xsup_enc = encode_tokens(xsup_f, xsup_mask, emb_in)              # (BM,Z,D)
    ysup_enc = memory_decoder_stub(ysup_f[:, 0], ysup_f[:, 1:], xsup_enc,
                                   xsup_mask, emb_out)               # (BM,Ly-1,D)

    xsup_enc = xsup_enc.reshape(B, M, Z, D)
    ysup_enc = ysup_enc.reshape(B, M, Ly - 1, D)
    xsup_mask = xsup_mask.reshape(B, M, Z)
    ysup_mask = ysup_mask.reshape(B, M, Ly)[:, :, 1:]
    ysup_ids = ysup[:, :, 1:]

    x_mask = x != 0
    x_enc_base = encode_tokens(x, x_mask, emb_in)                    # (B,S,D)

    supmask_f = xsup_mask.astype(jnp.float32) * \
        supmask[:, :, None].astype(jnp.float32)                      # (B,M,Z)

    # ---- Pallas hot path: align_inputs + SGRUCell merge ----
    x_enc = align_and_merge(x_enc_base, xsup_enc, supmask_f, merge_params)

    memmask = ysup_mask.astype(jnp.float32) * \
        supmask[:, :, None].astype(jnp.float32)
    out, predactions = decoder_stub(x_enc, y[:, 0], y[:, 1:], ysup_ids,
                                    ysup_enc, x_mask, memmask, emb_out)
    return out, predactions, x_enc, x_enc_base, xsup_enc, supmask_f


# --------------------------------------------------------------------------
# Pure-JAX reference for the fused kernel (correctness check)
# --------------------------------------------------------------------------
def align_and_merge_ref(x_enc_base, xsup_enc, supmask_f, Wt, bW, Ut, bU):
    D = x_enc_base.shape[-1]
    w = jnp.einsum('bsd,bmzd->bsmz', x_enc_base, xsup_enc)
    w = (w + jnp.log(supmask_f)[:, None, :, :]) / np.sqrt(D)
    ws = w.shape
    att = jax.nn.softmax(w.reshape(ws[0], ws[1], -1), -1).reshape(ws)
    summ = jnp.einsum('bsmz,bmzd->bsd', att, xsup_enc)
    # SGRU merge
    x = summ.reshape(-1, D)
    h = x_enc_base.reshape(-1, D)
    gates = jnp.concatenate([x, h], 1) @ Wt + bW
    g = [gates[:, i * D:(i + 1) * D] for i in range(5)]
    rx, rh = jax.nn.sigmoid(g[0]), jax.nn.sigmoid(g[1])
    z = jax.nn.softmax(jnp.stack(g[2:5], -1), -1)
    u = jnp.tanh(jnp.concatenate([x * rx, h * rh], 1) @ Ut + bU)
    h_new = (jnp.stack([x, h, u], -1) * z).sum(-1)
    return h_new.reshape(x_enc_base.shape)


# --------------------------------------------------------------------------
if __name__ == "__main__":
    B, M, S, Z, Ly, Ty, D, V = 2, 4, 8, 8, 9, 6, 32, 20

    key = jax.random.PRNGKey(0)
    k_emb_in, k_emb_out, k_W, k_bW, k_U, k_bU, k_x, k_y, k_xs, k_ys = \
        jax.random.split(key, 10)

    # Parameters (deterministic, PyTorch Linear convention W:(out,in) then
    # pre-transposed for the kernel wrapper).
    emb_in = 0.3 * jax.random.normal(k_emb_in, (V, D), jnp.float32)
    emb_out = 0.3 * jax.random.normal(k_emb_out, (V, D), jnp.float32)
    gateW_w = 0.2 * jax.random.normal(k_W, (5 * D, 2 * D), jnp.float32)
    gateW_b = 0.1 * jax.random.normal(k_bW, (5 * D,), jnp.float32)
    gateU_w = 0.2 * jax.random.normal(k_U, (D, 2 * D), jnp.float32)
    gateU_b = 0.1 * jax.random.normal(k_bU, (D,), jnp.float32)
    Wt = gateW_w.T                      # (2D, 5D)
    bW = gateW_b.reshape(1, 5 * D)
    Ut = gateU_w.T                      # (2D, D)
    bU = gateU_b.reshape(1, D)

    # One-time kernel-weight preparation (padding + bf16 cast), hoisted out of
    # the per-forward hot path.
    merge_params = prepare_merge_params(Wt, bW, Ut, bU)
    params = (emb_in, emb_out, merge_params)

    # Inputs (int token ids; 0 = padding)
    x = jax.random.randint(k_x, (B, S), 1, V)
    x = x.at[1, 6:].set(0)
    y = jax.random.randint(k_y, (B, Ty), 1, V)
    xsup = jax.random.randint(k_xs, (B, M, Z), 1, V)
    xsup = xsup.at[:, :, 6:].set(0)
    ysup = jax.random.randint(k_ys, (B, M, Ly), 1, V)
    supmask = jnp.ones((B, M), dtype=bool).at[1, 3].set(False)

    fwd = jax.jit(meta_seq_mem_nn_forward)
    out, predactions, x_enc, x_enc_base, xsup_enc, supmask_f = \
        fwd(params, x, y, xsup, ysup, supmask)
    jax.block_until_ready((out, predactions, x_enc))

    # Check the Pallas hot path against a pure-JAX reference.
    x_enc_ref = align_and_merge_ref(x_enc_base, xsup_enc, supmask_f,
                                    Wt, bW, Ut, bU)
    np.testing.assert_allclose(np.asarray(x_enc), np.asarray(x_enc_ref),
                               rtol=5e-2, atol=5e-2)

    assert out.shape == (B, Ty - 1, V)
    assert predactions.shape == (B, Ty - 1)
    print("KERNEL_OK")
</pallas_src>

<mosaic_0001>
module attributes {stable_mosaic.version = 11 : i64} {
  func.func @_align_merge_kernel(%arg0: i32, %arg1: i32, %arg2: memref<2x8x128xf32, #tpu.memory_space<vmem>>, %arg3: memref<2x128x128xbf16, #tpu.memory_space<vmem>>, %arg4: memref<2x1x128xf32, #tpu.memory_space<vmem>>, %arg5: memref<128x256xbf16, #tpu.memory_space<vmem>>, %arg6: memref<128x256xbf16, #tpu.memory_space<vmem>>, %arg7: memref<1x256xf32, #tpu.memory_space<vmem>>, %arg8: memref<128x384xbf16, #tpu.memory_space<vmem>>, %arg9: memref<128x384xbf16, #tpu.memory_space<vmem>>, %arg10: memref<1x384xf32, #tpu.memory_space<vmem>>, %arg11: memref<128x128xbf16, #tpu.memory_space<vmem>>, %arg12: memref<128x128xbf16, #tpu.memory_space<vmem>>, %arg13: memref<1x128xf32, #tpu.memory_space<vmem>>, %arg14: memref<2x8x128xf32, #tpu.memory_space<vmem>>) attributes {dimension_semantics = [#tpu.dimension_semantics<parallel>, #tpu.dimension_semantics<parallel>], iteration_bounds = array<i64: 1, 1>, scalar_prefetch = 0 : i64, scratch_operands = 0 : i64, tpu.core_type = #tpu.core_type<tc>, window_params = [{transform_indices = @transform_0, window_bounds = array<i64: 2, 8, 128>}, {transform_indices = @transform_1, window_bounds = array<i64: 2, 128, 128>}, {transform_indices = @transform_2, window_bounds = array<i64: 2, 1, 128>}, {pipeline_mode = #tpu.pipeline_mode<synchronous>, transform_indices = @transform_3, window_bounds = array<i64: 128, 256>}, {pipeline_mode = #tpu.pipeline_mode<synchronous>, transform_indices = @transform_4, window_bounds = array<i64: 128, 256>}, {pipeline_mode = #tpu.pipeline_mode<synchronous>, transform_indices = @transform_5, window_bounds = array<i64: 1, 256>}, {pipeline_mode = #tpu.pipeline_mode<synchronous>, transform_indices = @transform_6, window_bounds = array<i64: 128, 384>}, {pipeline_mode = #tpu.pipeline_mode<synchronous>, transform_indices = @transform_7, window_bounds = array<i64: 128, 384>}, {pipeline_mode = #tpu.pipeline_mode<synchronous>, transform_indices = @transform_8, window_bounds = array<i64: 1, 384>}, {pipeline_mode = #tpu.pipeline_mode<synchronous>, transform_indices = @transform_9, window_bounds = array<i64: 128, 128>}, {pipeline_mode = #tpu.pipeline_mode<synchronous>, transform_indices = @transform_10, window_bounds = array<i64: 128, 128>}, {pipeline_mode = #tpu.pipeline_mode<synchronous>, transform_indices = @transform_11, window_bounds = array<i64: 1, 128>}, {transform_indices = @transform_12, window_bounds = array<i64: 2, 8, 128>}]} {
    %c0 = arith.constant 0 : index
    %c0_0 = arith.constant 0 : index
    %c0_1 = arith.constant 0 : index
    %0 = vector.load %arg2[%c0, %c0_0, %c0_1] : memref<2x8x128xf32, #tpu.memory_space<vmem>>, vector<2x8x128xf32>
    %c0_2 = arith.constant 0 : index
    %c0_3 = arith.constant 0 : index
    %c0_4 = arith.constant 0 : index
    %1 = vector.load %arg3[%c0_2, %c0_3, %c0_4] : memref<2x128x128xbf16, #tpu.memory_space<vmem>>, vector<2x128x128xbf16>
    %2 = arith.truncf %0 : vector<2x8x128xf32> to vector<2x8x128xbf16>
    "tpu.trace_start"() <{level = 10 : i32, message = "bsd,bkd->bsk"}> : () -> ()
    %cst = arith.constant dense<0.000000e+00> : vector<2x8x128xf32>
    %3 = tpu.matmul %2, %1, %cst {dimension_numbers = #tpu.dot_dimension_numbers<[2], [2], [1], [1], [0, 0, 0, 1, 1, 1], [0], [0]>} : vector<2x8x128xbf16>, vector<2x128x128xbf16>, vector<2x8x128xf32> -> vector<2x8x128xf32>
    "tpu.trace_stop"() : () -> ()
    %cst_5 = arith.constant 0.176776692 : f32
    %4 = vector.broadcast %cst_5 : f32 to vector<2x8x128xf32>
    %5 = arith.mulf %3, %4 : vector<2x8x128xf32>
    %c0_6 = arith.constant 0 : index
    %c0_7 = arith.constant 0 : index
    %c0_8 = arith.constant 0 : index
    %6 = vector.load %arg4[%c0_6, %c0_7, %c0_8] : memref<2x1x128xf32, #tpu.memory_space<vmem>>, vector<2x1x128xf32>
    %7 = vector.broadcast %6 : vector<2x1x128xf32> to vector<2x8x128xf32>
    %8 = arith.addf %5, %7 : vector<2x8x128xf32>
    %cst_9 = arith.constant dense<0xFF800000> : vector<2x8xf32>
    %9 = vector.multi_reduction <maximumf>, %8, %cst_9 [2] : vector<2x8x128xf32> to vector<2x8xf32>
    %10 = vector.shape_cast %9 : vector<2x8xf32> to vector<2x8x1xf32>
    %11 = vector.broadcast %10 : vector<2x8x1xf32> to vector<2x8x128xf32>
    %12 = arith.subf %8, %11 : vector<2x8x128xf32>
    %13 = math.exp %12 : vector<2x8x128xf32>
    %cst_10 = arith.constant dense<0.000000e+00> : vector<2x8xf32>
    %14 = vector.multi_reduction <add>, %13, %cst_10 [2] : vector<2x8x128xf32> to vector<2x8xf32>
    %15 = vector.shape_cast %14 : vector<2x8xf32> to vector<2x8x1xf32>
    %16 = tpu.reciprocal %15 {approx = true} : vector<2x8x1xf32> -> vector<2x8x1xf32>
    %17 = vector.broadcast %16 : vector<2x8x1xf32> to vector<2x8x128xf32>
    %18 = arith.mulf %13, %17 : vector<2x8x128xf32>
    %19 = arith.truncf %18 : vector<2x8x128xf32> to vector<2x8x128xbf16>
    "tpu.trace_start"() <{level = 10 : i32, message = "bsk,bkd->bsd"}> : () -> ()
    %cst_11 = arith.constant dense<0.000000e+00> : vector<2x8x128xf32>
    %20 = tpu.matmul %19, %1, %cst_11 {dimension_numbers = #tpu.dot_dimension_numbers<[2], [1], [1], [2], [0, 0, 0, 1, 1, 2], [0], [0]>} : vector<2x8x128xbf16>, vector<2x128x128xbf16>, vector<2x8x128xf32> -> vector<2x8x128xf32>
    "tpu.trace_stop"() : () -> ()
    %21 = vector.shape_cast %20 : vector<2x8x128xf32> to vector<16x128xf32>
    %22 = vector.shape_cast %0 : vector<2x8x128xf32> to vector<16x128xf32>
    %23 = arith.truncf %21 : vector<16x128xf32> to vector<16x128xbf16>
    %24 = arith.truncf %22 : vector<16x128xf32> to vector<16x128xbf16>
    %c0_12 = arith.constant 0 : index
    %c0_13 = arith.constant 0 : index
    %25 = vector.load %arg5[%c0_12, %c0_13] : memref<128x256xbf16, #tpu.memory_space<vmem>>, vector<128x256xbf16>
    %cst_14 = arith.constant dense<0.000000e+00> : vector<16x256xf32>
    %26 = tpu.matmul %23, %25, %cst_14 {dimension_numbers = #tpu.dot_dimension_numbers<[1], [0], [0], [1], [0, 0, 1, 1], [], []>} : vector<16x128xbf16>, vector<128x256xbf16>, vector<16x256xf32> -> vector<16x256xf32>
    %c0_15 = arith.constant 0 : index
    %c0_16 = arith.constant 0 : index
    %27 = vector.load %arg6[%c0_15, %c0_16] : memref<128x256xbf16, #tpu.memory_space<vmem>>, vector<128x256xbf16>
    %cst_17 = arith.constant dense<0.000000e+00> : vector<16x256xf32>
    %28 = tpu.matmul %24, %27, %cst_17 {dimension_numbers = #tpu.dot_dimension_numbers<[1], [0], [0], [1], [0, 0, 1, 1], [], []>} : vector<16x128xbf16>, vector<128x256xbf16>, vector<16x256xf32> -> vector<16x256xf32>
    %29 = arith.addf %26, %28 : vector<16x256xf32>
    %c0_18 = arith.constant 0 : index
    %c0_19 = arith.constant 0 : index
    %30 = vector.load %arg7[%c0_18, %c0_19] : memref<1x256xf32, #tpu.memory_space<vmem>>, vector<1x256xf32>
    %31 = vector.broadcast %30 : vector<1x256xf32> to vector<16x256xf32>
    %32 = arith.addf %29, %31 : vector<16x256xf32>
    %33 = vector.extract_strided_slice %32 {offsets = [0, 0], sizes = [16, 128], strides = [1, 1]} : vector<16x256xf32> to vector<16x128xf32>
    %34 = arith.negf %33 : vector<16x128xf32>
    %35 = math.exp %34 : vector<16x128xf32>
    %cst_20 = arith.constant 1.000000e+00 : f32
    %36 = vector.broadcast %cst_20 : f32 to vector<16x128xf32>
    %37 = arith.addf %36, %35 : vector<16x128xf32>
    %38 = arith.divf %36, %37 : vector<16x128xf32>
    %39 = vector.extract_strided_slice %32 {offsets = [0, 128], sizes = [16, 128], strides = [1, 1]} : vector<16x256xf32> to vector<16x128xf32>
    %40 = arith.negf %39 : vector<16x128xf32>
    %41 = math.exp %40 : vector<16x128xf32>
    %cst_21 = arith.constant 1.000000e+00 : f32
    %42 = vector.broadcast %cst_21 : f32 to vector<16x128xf32>
    %43 = arith.addf %42, %41 : vector<16x128xf32>
    %44 = arith.divf %42, %43 : vector<16x128xf32>
    %45 = arith.mulf %21, %38 : vector<16x128xf32>
    %46 = arith.truncf %45 : vector<16x128xf32> to vector<16x128xbf16>
    %c0_22 = arith.constant 0 : index
    %c0_23 = arith.constant 0 : index
    %47 = vector.load %arg11[%c0_22, %c0_23] : memref<128x128xbf16, #tpu.memory_space<vmem>>, vector<128x128xbf16>
    %cst_24 = arith.constant dense<0.000000e+00> : vector<16x128xf32>
    %48 = tpu.matmul %46, %47, %cst_24 {dimension_numbers = #tpu.dot_dimension_numbers<[1], [0], [0], [1], [0, 0, 1, 1], [], []>} : vector<16x128xbf16>, vector<128x128xbf16>, vector<16x128xf32> -> vector<16x128xf32>
    %49 = arith.mulf %22, %44 : vector<16x128xf32>
    %50 = arith.truncf %49 : vector<16x128xf32> to vector<16x128xbf16>
    %c0_25 = arith.constant 0 : index
    %c0_26 = arith.constant 0 : index
    %51 = vector.load %arg12[%c0_25, %c0_26] : memref<128x128xbf16, #tpu.memory_space<vmem>>, vector<128x128xbf16>
    %cst_27 = arith.constant dense<0.000000e+00> : vector<16x128xf32>
    %52 = tpu.matmul %50, %51, %cst_27 {dimension_numbers = #tpu.dot_dimension_numbers<[1], [0], [0], [1], [0, 0, 1, 1], [], []>} : vector<16x128xbf16>, vector<128x128xbf16>, vector<16x128xf32> -> vector<16x128xf32>
    %53 = arith.addf %48, %52 : vector<16x128xf32>
    %c0_28 = arith.constant 0 : index
    %c0_29 = arith.constant 0 : index
    %54 = vector.load %arg13[%c0_28, %c0_29] : memref<1x128xf32, #tpu.memory_space<vmem>>, vector<1x128xf32>
    %55 = vector.broadcast %54 : vector<1x128xf32> to vector<16x128xf32>
    %56 = arith.addf %53, %55 : vector<16x128xf32>
    %57 = math.tanh %56 : vector<16x128xf32>
    %c0_30 = arith.constant 0 : index
    %c0_31 = arith.constant 0 : index
    %58 = vector.load %arg8[%c0_30, %c0_31] : memref<128x384xbf16, #tpu.memory_space<vmem>>, vector<128x384xbf16>
    %cst_32 = arith.constant dense<0.000000e+00> : vector<16x384xf32>
    %59 = tpu.matmul %23, %58, %cst_32 {dimension_numbers = #tpu.dot_dimension_numbers<[1], [0], [0], [1], [0, 0, 1, 1], [], []>} : vector<16x128xbf16>, vector<128x384xbf16>, vector<16x384xf32> -> vector<16x384xf32>
    %c0_33 = arith.constant 0 : index
    %c0_34 = arith.constant 0 : index
    %60 = vector.load %arg9[%c0_33, %c0_34] : memref<128x384xbf16, #tpu.memory_space<vmem>>, vector<128x384xbf16>
    %cst_35 = arith.constant dense<0.000000e+00> : vector<16x384xf32>
    %61 = tpu.matmul %24, %60, %cst_35 {dimension_numbers = #tpu.dot_dimension_numbers<[1], [0], [0], [1], [0, 0, 1, 1], [], []>} : vector<16x128xbf16>, vector<128x384xbf16>, vector<16x384xf32> -> vector<16x384xf32>
    %62 = arith.addf %59, %61 : vector<16x384xf32>
    %c0_36 = arith.constant 0 : index
    %c0_37 = arith.constant 0 : index
    %63 = vector.load %arg10[%c0_36, %c0_37] : memref<1x384xf32, #tpu.memory_space<vmem>>, vector<1x384xf32>
    %64 = vector.broadcast %63 : vector<1x384xf32> to vector<16x384xf32>
    %65 = arith.addf %62, %64 : vector<16x384xf32>
    %66 = vector.extract_strided_slice %65 {offsets = [0, 0], sizes = [16, 128], strides = [1, 1]} : vector<16x384xf32> to vector<16x128xf32>
    %67 = vector.extract_strided_slice %65 {offsets = [0, 128], sizes = [16, 128], strides = [1, 1]} : vector<16x384xf32> to vector<16x128xf32>
    %68 = vector.extract_strided_slice %65 {offsets = [0, 256], sizes = [16, 128], strides = [1, 1]} : vector<16x384xf32> to vector<16x128xf32>
    %69 = arith.maximumf %66, %67 : vector<16x128xf32>
    %70 = arith.maximumf %69, %68 : vector<16x128xf32>
    %71 = arith.subf %66, %70 : vector<16x128xf32>
    %72 = math.exp %71 : vector<16x128xf32>
    %73 = arith.subf %67, %70 : vector<16x128xf32>
    %74 = math.exp %73 : vector<16x128xf32>
    %75 = arith.subf %68, %70 : vector<16x128xf32>
    %76 = math.exp %75 : vector<16x128xf32>
    %77 = arith.addf %72, %74 : vector<16x128xf32>
    %78 = arith.addf %77, %76 : vector<16x128xf32>
    %79 = tpu.reciprocal %78 {approx = true} : vector<16x128xf32> -> vector<16x128xf32>
    %80 = arith.mulf %72, %79 : vector<16x128xf32>
    %81 = arith.mulf %21, %80 : vector<16x128xf32>
    %82 = arith.mulf %74, %79 : vector<16x128xf32>
    %83 = arith.mulf %22, %82 : vector<16x128xf32>
    %84 = arith.addf %81, %83 : vector<16x128xf32>
    %85 = arith.mulf %76, %79 : vector<16x128xf32>
    %86 = arith.mulf %57, %85 : vector<16x128xf32>
    %87 = arith.addf %84, %86 : vector<16x128xf32>
    %88 = vector.shape_cast %87 : vector<16x128xf32> to vector<2x8x128xf32>
    %c0_38 = arith.constant 0 : index
    %c0_39 = arith.constant 0 : index
    %c0_40 = arith.constant 0 : index
    %89 = vector.load %arg14[%c0_38, %c0_39, %c0_40] : memref<2x8x128xf32, #tpu.memory_space<vmem>>, vector<2x8x128xf32>
    tpu.vector_store %arg14[%c0_38, %c0_39, %c0_40], %88 {strides = array<i32>} : memref<2x8x128xf32, #tpu.memory_space<vmem>>, vector<2x8x128xf32>,
    return
  }
  func.func @transform_0(%arg0: i32, %arg1: i32) -> (i32, i32, i32) {
    %c0_i32 = arith.constant 0 : i32
    %c0_i32_0 = arith.constant 0 : i32
    return %arg0, %arg1, %c0_i32 : i32, i32, i32
  }
  func.func @transform_1(%arg0: i32, %arg1: i32) -> (i32, i32, i32) {
    %c0_i32 = arith.constant 0 : i32
    %c0_i32_0 = arith.constant 0 : i32
    %c0_i32_1 = arith.constant 0 : i32
    return %arg0, %c0_i32, %c0_i32_0 : i32, i32, i32
  }
  func.func @transform_2(%arg0: i32, %arg1: i32) -> (i32, i32, i32) {
    %c0_i32 = arith.constant 0 : i32
    %c0_i32_0 = arith.constant 0 : i32
    %c0_i32_1 = arith.constant 0 : i32
    return %arg0, %c0_i32, %c0_i32_0 : i32, i32, i32
  }
  func.func @transform_3(%arg0: i32, %arg1: i32) -> (i32, i32) {
    %c0_i32 = arith.constant 0 : i32
    %c0_i32_0 = arith.constant 0 : i32
    %c0_i32_1 = arith.constant 0 : i32
    return %c0_i32, %c0_i32_0 : i32, i32
  }
  func.func @transform_4(%arg0: i32, %arg1: i32) -> (i32, i32) {
    %c0_i32 = arith.constant 0 : i32
    %c0_i32_0 = arith.constant 0 : i32
    %c0_i32_1 = arith.constant 0 : i32
    return %c0_i32, %c0_i32_0 : i32, i32
  }
  func.func @transform_5(%arg0: i32, %arg1: i32) -> (i32, i32) {
    %c0_i32 = arith.constant 0 : i32
    %c0_i32_0 = arith.constant 0 : i32
    %c0_i32_1 = arith.constant 0 : i32
    return %c0_i32, %c0_i32_0 : i32, i32
  }
  func.func @transform_6(%arg0: i32, %arg1: i32) -> (i32, i32) {
    %c0_i32 = arith.constant 0 : i32
    %c0_i32_0 = arith.constant 0 : i32
    %c0_i32_1 = arith.constant 0 : i32
    return %c0_i32, %c0_i32_0 : i32, i32
  }
  func.func @transform_7(%arg0: i32, %arg1: i32) -> (i32, i32) {
    %c0_i32 = arith.constant 0 : i32
    %c0_i32_0 = arith.constant 0 : i32
    %c0_i32_1 = arith.constant 0 : i32
    return %c0_i32, %c0_i32_0 : i32, i32
  }
  func.func @transform_8(%arg0: i32, %arg1: i32) -> (i32, i32) {
    %c0_i32 = arith.constant 0 : i32
    %c0_i32_0 = arith.constant 0 : i32
    %c0_i32_1 = arith.constant 0 : i32
    return %c0_i32, %c0_i32_0 : i32, i32
  }
  func.func @transform_9(%arg0: i32, %arg1: i32) -> (i32, i32) {
    %c0_i32 = arith.constant 0 : i32
    %c0_i32_0 = arith.constant 0 : i32
    %c0_i32_1 = arith.constant 0 : i32
    return %c0_i32, %c0_i32_0 : i32, i32
  }
  func.func @transform_10(%arg0: i32, %arg1: i32) -> (i32, i32) {
    %c0_i32 = arith.constant 0 : i32
    %c0_i32_0 = arith.constant 0 : i32
    %c0_i32_1 = arith.constant 0 : i32
    return %c0_i32, %c0_i32_0 : i32, i32
  }
  func.func @transform_11(%arg0: i32, %arg1: i32) -> (i32, i32) {
    %c0_i32 = arith.constant 0 : i32
    %c0_i32_0 = arith.constant 0 : i32
    %c0_i32_1 = arith.constant 0 : i32
    return %c0_i32, %c0_i32_0 : i32, i32
  }
  func.func @transform_12(%arg0: i32, %arg1: i32) -> (i32, i32, i32) {
    %c0_i32 = arith.constant 0 : i32
    %c0_i32_0 = arith.constant 0 : i32
    return %arg0, %arg1, %c0_i32 : i32, i32, i32
  }
}

</mosaic_0001>

<bundles_post_ra>
// kernel: meta_seq_mem_nn_forward.1
= control target key start
LH: loop header
LB: loop body
LE: loop exit
PB: predicated region body
PF: predicated region fallthrough
CT: control target
= control target key end

     0   :  { %v2032_v0 = vmov 0.0   ;;  %vm2033_vm0 = vmmov 0   ;;  %v2034_v54 = vmov 0   ;;  %s2625_s1 = inlined_call_operand.vmem [shape: bf16[2,128,128], index: 1, kind: input, shape index: {}]   ;;  %s2626_s0 = inlined_call_operand.vmem [shape: f32[2,8,128], index: 0, kind: input, shape index: {}]   ;;  %s2627_s2 = inlined_call_operand.vmem [shape: f32[2,1,128], index: 2, kind: input, shape index: {}]   ;;  %s2628_s4 = inlined_call_operand.vmem [shape: bf16[128,256], index: 4, kind: input, shape index: {}]   ;;  %s2629_s3 = inlined_call_operand.vmem [shape: bf16[128,256], index: 3, kind: input, shape index: {}]   ;;  %s2630_s7 = inlined_call_operand.vmem [shape: bf16[128,384], index: 7, kind: input, shape index: {}]   ;;  %s2631_s6 = inlined_call_operand.vmem [shape: bf16[128,384], index: 6, kind: input, shape index: {}]   ;;  %s2632_s10 = inlined_call_operand.vmem [shape: bf16[128,128], index: 10, kind: input, shape index: {}]   ;;  %s2633_s9 = inlined_call_operand.vmem [shape: bf16[128,128], index: 9, kind: input, shape index: {}]   ;;  %s2634_s5 = inlined_call_operand.vmem [shape: f32[1,256], index: 5, kind: input, shape index: {}]   ;;  %s2635_s8 = inlined_call_operand.vmem [shape: f32[1,384], index: 8, kind: input, shape index: {}]   ;;  %s2636_s11 = inlined_call_operand.vmem [shape: f32[1,128], index: 11, kind: input, shape index: {}]   ;;  %s2637_s12 = inlined_call_operand.vmem [shape: f32[2,8,128], index: 12, kind: output, shape index: {}]  }
   0x1   :  { %1671 = vmatprep.subr.bf16.mxu0 %v2032_v0  ;;  %v1842_v1 = vld [vmem:[%s2625_s1] sm:$0xff]   ;;  %1691 = vmatprep.subr.bf16.mxu1 %v2032_v0  ;;  %v1844_v3 = vld [vmem:[%s2625_s1 + $0x8] sm:$0xff]   ;;  %v1846_v5 = vld [vmem:[%s2625_s1 + $0x10] sm:$0xff]  }
   0x2   :  { %v1843_v2 = vld [vmem:[%s2625_s1 + $0x40] sm:$0xff]   ;;  %1687 = vmatprep.mubr.msk.bf16.mxu0 %vm2033_vm0, %v2032_v0  ;;  %1707 = vmatprep.mubr.msk.bf16.mxu1 %vm2033_vm0, %v2032_v0  ;;  %v1845_v4 = vld [vmem:[%s2625_s1 + $0x48] sm:$0xff]   ;;  %v1847_v6 = vld [vmem:[%s2625_s1 + $0x50] sm:$0xff]  }
   0x3   :  { %1672 = vmatpush3.bf16.xpose.msra.mxu0 %v1842_v1  ;;  %1692 = vmatpush3.bf16.xpose.msra.mxu1 %v1843_v2  ;;  %v1848_v7 = vld [vmem:[%s2625_s1 + $0x18] sm:$0xff]   ;;  %v1850_v9 = vld [vmem:[%s2625_s1 + $0x20] sm:$0xff]   ;;  %v1852_v11 = vld [vmem:[%s2625_s1 + $0x28] sm:$0xff]  }
   0x4   :  { %1673 = vmatprep.subr.bf16.mxu0 %v2032_v0  ;;  %1693 = vmatprep.subr.bf16.mxu1 %v2032_v0  ;;  %v1849_v8 = vld [vmem:[%s2625_s1 + $0x58] sm:$0xff]   ;;  %v1851_v10 = vld [vmem:[%s2625_s1 + $0x60] sm:$0xff]   ;;  %v1853_v12 = vld [vmem:[%s2625_s1 + $0x68] sm:$0xff]  }
   0x5   :  { %v1854_v13 = vld [vmem:[%s2625_s1 + $0x30] sm:$0xff]   ;;  %v1856_v15 = vld [vmem:[%s2625_s1 + $0x38] sm:$0xff]   ;;  %v2171_v17 = vld [vmem:[%s2626_s0] sm:$0xff] }
   0x6   :  { %v1855_v14 = vld [vmem:[%s2625_s1 + $0x70] sm:$0xff]   ;;  %v1857_v16 = vld [vmem:[%s2625_s1 + $0x78] sm:$0xff]   ;;  %v2176_v18 = vld [vmem:[%s2626_s0 + $0x8] sm:$0xff]  ;;  %v76_v19 = vpack.c.bf16 %v2171_v17, %v2171_v17 }
   0x7   :  { %v77_v20 = vpack.c.bf16 %v2176_v18, %v2176_v18  ;;  %v1496_v22 = vld [vmem:[%s2627_s2] ss:$0 sm:$0xff]  ;;  %v1497_v29 = vld [vmem:[%s2627_s2 + $0x1] ss:$0 sm:$0xff]  ;;  %v1860_v43 = vld [vmem:[%s2628_s4 + $0x4] ss:$8 sps:$4 sm:$0xff]  }
   0x8   :  { %v1858_v48 = vld [vmem:[%s2628_s4] ss:$8 sps:$4 sm:$0xff]   ;;  %v1863_v50 = vld [vmem:[%s2628_s4 + $0x14] ss:$8 sps:$4 sm:$0xff]   ;;  %v1861_v53 = vld [vmem:[%s2628_s4 + $0x10] ss:$8 sps:$4 sm:$0xff]  }
   0x9   :  { %v1866_v56 = vld [vmem:[%s2628_s4 + $0x24] ss:$8 sps:$4 sm:$0xff]   ;;  %v1864_v57 = vld [vmem:[%s2628_s4 + $0x20] ss:$8 sps:$4 sm:$0xff]   ;;  %v1869_v58 = vld [vmem:[%s2628_s4 + $0x34] ss:$8 sps:$4 sm:$0xff]  }
   0xa   :  { %v1867_v59 = vld [vmem:[%s2628_s4 + $0x30] ss:$8 sps:$4 sm:$0xff]   ;;  %v1872_v60 = vld [vmem:[%s2628_s4 + $0x44] ss:$8 sps:$4 sm:$0xff]   ;;  %v1870_v61 = vld [vmem:[%s2628_s4 + $0x40] ss:$8 sps:$4 sm:$0xff]  }
   0xb   :  { %1674 = vmatpush3.bf16.xpose.msra.mxu0 %v1844_v3  ;;  %1694 = vmatpush3.bf16.xpose.msra.mxu1 %v1845_v4  ;;  %v1875_v62 = vld [vmem:[%s2628_s4 + $0x54] ss:$8 sps:$4 sm:$0xff]   ;;  %v1873_v63 = vld [vmem:[%s2628_s4 + $0x50] ss:$8 sps:$4 sm:$0xff]  }
   0xc   :  { %1675 = vmatprep.subr.bf16.mxu0 %v2032_v0  ;;  %1695 = vmatprep.subr.bf16.mxu1 %v2032_v0 }
  0x13   :  { %1676 = vmatpush3.bf16.xpose.msra.mxu0 %v1846_v5  ;;  %1696 = vmatpush3.bf16.xpose.msra.mxu1 %v1847_v6 }
  0x14   :  { %1677 = vmatprep.subr.bf16.mxu0 %v2032_v0  ;;  %1697 = vmatprep.subr.bf16.mxu1 %v2032_v0 }
  0x1b   :  { %1678 = vmatpush3.bf16.xpose.msra.mxu0 %v1848_v7  ;;  %1698 = vmatpush3.bf16.xpose.msra.mxu1 %v1849_v8 }
  0x1c   :  { %1679 = vmatprep.subr.bf16.mxu0 %v2032_v0  ;;  %1699 = vmatprep.subr.bf16.mxu1 %v2032_v0 }
  0x23   :  { %1680 = vmatpush3.bf16.xpose.msra.mxu0 %v1850_v9  ;;  %1700 = vmatpush3.bf16.xpose.msra.mxu1 %v1851_v10 }
  0x24   :  { %1681 = vmatprep.subr.bf16.mxu0 %v2032_v0  ;;  %1701 = vmatprep.subr.bf16.mxu1 %v2032_v0 }
  0x2b   :  { %1682 = vmatpush3.bf16.xpose.msra.mxu0 %v1852_v11  ;;  %1702 = vmatpush3.bf16.xpose.msra.mxu1 %v1853_v12 }
  0x2c   :  { %1683 = vmatprep.subr.bf16.mxu0 %v2032_v0  ;;  %1703 = vmatprep.subr.bf16.mxu1 %v2032_v0 }
  0x33   :  { %1684 = vmatpush3.bf16.xpose.msra.mxu0 %v1854_v13  ;;  %1704 = vmatpush3.bf16.xpose.msra.mxu1 %v1855_v14 }
  0x34   :  { %1685 = vmatprep.subr.bf16.mxu0 %v2032_v0  ;;  %1705 = vmatprep.subr.bf16.mxu1 %v2032_v0 }
  0x3b   :  { %1686 = vmatpush3.bf16.xpose.msra.mxu0 %v1856_v15  ;;  %1706 = vmatpush3.bf16.xpose.msra.mxu1 %v1857_v16 }
  0x3c   :  { %1711 = vmatprep.subr.bf16.mxu0 %v2032_v0  ;;  %1731 = vmatprep.subr.bf16.mxu1 %v2032_v0 }
  0x42   :  { %1688 = vmatmul.mubr.bf16.vlgmr.msra.gmra.mrb[0].mxu0 %v76_v19  ;;  %1708 = vmatmul.mubr.bf16.vlgmr.msra.gmra.mrb[0].mxu1 %v77_v20  ;;  %v1897_v19 = vld [vmem:[%s2629_s3 + $0x50] ss:$8 sps:$4 sm:$0xff]   ;;  %v1902_v20 = vld [vmem:[%s2629_s3 + $0x64] ss:$8 sps:$4 sm:$0xff]  }
  0x43   :  { %1712 = vmatpush3.bf16.msra.mxu0 %v1842_v1  ;;  %1732 = vmatpush3.bf16.msra.mxu1 %v1843_v2  ;;  %v1878_v1 = vld [vmem:[%s2628_s4 + $0x64] ss:$8 sps:$4 sm:$0xff]   ;;  %v1876_v2 = vld [vmem:[%s2628_s4 + $0x60] ss:$8 sps:$4 sm:$0xff]  }
  0x44   :  { %1713 = vmatprep.subr.bf16.mxu0 %v2032_v0  ;;  %1733 = vmatprep.subr.bf16.mxu1 %v2032_v0 }
  0x45   :  { %1727 = vmatprep.mubr.msk.bf16.mxu0 %vm2033_vm0, %v2032_v0  ;;  %1747 = vmatprep.mubr.msk.bf16.mxu1 %vm2033_vm0, %v2032_v0 }
  0x47   :  { %1714 = vmatpush3.bf16.msra.mxu0 %v1844_v3  ;;  %1734 = vmatpush3.bf16.msra.mxu1 %v1845_v4  ;;  %v1881_v3 = vld [vmem:[%s2628_s4 + $0x74] ss:$8 sps:$4 sm:$0xff]   ;;  %v1879_v4 = vld [vmem:[%s2628_s4 + $0x70] ss:$8 sps:$4 sm:$0xff]  }
  0x48   :  { %1715 = vmatprep.subr.bf16.mxu0 %v2032_v0  ;;  %1735 = vmatprep.subr.bf16.mxu1 %v2032_v0 }
  0x4b   :  { %1716 = vmatpush3.bf16.msra.mxu0 %v1846_v5  ;;  %1736 = vmatpush3.bf16.msra.mxu1 %v1847_v6  ;;  %v1884_v5 = vld [vmem:[%s2629_s3 + $0x4] ss:$8 sps:$4 sm:$0xff]   ;;  %v2265_v6 = vpack.c.bf16 %v2176_v18, %v2171_v17 }
  0x4c   :  { %1717 = vmatprep.subr.bf16.mxu0 %v2032_v0  ;;  %1737 = vmatprep.subr.bf16.mxu1 %v2032_v0 }
  0x4f   :  { %1718 = vmatpush3.bf16.msra.mxu0 %v1848_v7  ;;  %1738 = vmatpush3.bf16.msra.mxu1 %v1849_v8  ;;  %v1882_v7 = vld [vmem:[%s2629_s3] ss:$8 sps:$4 sm:$0xff]   ;;  %v1887_v8 = vld [vmem:[%s2629_s3 + $0x14] ss:$8 sps:$4 sm:$0xff]  }
  0x50   :  { %1719 = vmatprep.subr.bf16.mxu0 %v2032_v0  ;;  %1739 = vmatprep.subr.bf16.mxu1 %v2032_v0 }
  0x53   :  { %1720 = vmatpush3.bf16.msra.mxu0 %v1850_v9  ;;  %1740 = vmatpush3.bf16.msra.mxu1 %v1851_v10  ;;  %v1885_v9 = vld [vmem:[%s2629_s3 + $0x10] ss:$8 sps:$4 sm:$0xff]   ;;  %v1890_v10 = vld [vmem:[%s2629_s3 + $0x24] ss:$8 sps:$4 sm:$0xff]  }
  0x54   :  { %1721 = vmatprep.subr.bf16.mxu0 %v2032_v0  ;;  %1741 = vmatprep.subr.bf16.mxu1 %v2032_v0 }
  0x57   :  { %1722 = vmatpush3.bf16.msra.mxu0 %v1852_v11  ;;  %1742 = vmatpush3.bf16.msra.mxu1 %v1853_v12  ;;  %v1888_v11 = vld [vmem:[%s2629_s3 + $0x20] ss:$8 sps:$4 sm:$0xff]   ;;  %v1893_v12 = vld [vmem:[%s2629_s3 + $0x34] ss:$8 sps:$4 sm:$0xff]  }
  0x58   :  { %1723 = vmatprep.subr.bf16.mxu0 %v2032_v0  ;;  %1743 = vmatprep.subr.bf16.mxu1 %v2032_v0 }
  0x5b   :  { %1724 = vmatpush3.bf16.msra.mxu0 %v1854_v13  ;;  %1744 = vmatpush3.bf16.msra.mxu1 %v1855_v14  ;;  %v1891_v13 = vld [vmem:[%s2629_s3 + $0x30] ss:$8 sps:$4 sm:$0xff]   ;;  %v1896_v14 = vld [vmem:[%s2629_s3 + $0x44] ss:$8 sps:$4 sm:$0xff]  }
  0x5c   :  { %1725 = vmatprep.subr.bf16.mxu0 %v2032_v0  ;;  %1745 = vmatprep.subr.bf16.mxu1 %v2032_v0 }
  0x5f   :  { %1726 = vmatpush3.bf16.msra.mxu0 %v1856_v15  ;;  %1746 = vmatpush3.bf16.msra.mxu1 %v1857_v16  ;;  %v1894_v15 = vld [vmem:[%s2629_s3 + $0x40] ss:$8 sps:$4 sm:$0xff]   ;;  %v1899_v16 = vld [vmem:[%s2629_s3 + $0x54] ss:$8 sps:$4 sm:$0xff]  }
  0x60   :  { %1751 = vmatprep.subr.bf16.mxu1 %v2032_v0  ;;  %486 = vmatprep.subr.bf16.mxu0 %v1860_v43  ;;  %v1923_v43 = vld [vmem:[%s2630_s7 + $0x7c] ss:$12 sps:$4 sm:$0xff]  }
 0x115   :  { %v160_v21 = vpop.f32.mrb[0].mxu0  ;;  %v248_v25 = vpop.f32.mrb[0].mxu1 }
 0x116   :  { %v254_v23 = vmul.f32 0.17677669, %v160_v21  ;;  %v1689_v24 = vpop.f32.mrb[1].mxu0  ;;  %v255_v26 = vmul.f32 0.17677669, %v248_v25  ;;  %v1709_v28 = vpop.f32.mrb[1].mxu1 }
 0x117   :  { %v163_v27 = vpop.f32.mrb[2].mxu0  ;;  %v251_v31 = vpop.f32.mrb[2].mxu1  ;;  %v1900_v21 = vld [vmem:[%s2629_s3 + $0x60] ss:$8 sps:$4 sm:$0xff]   ;;  %v1908_v24 = vld [vmem:[%s2630_s7 + $0x4] ss:$12 sps:$4 sm:$0xff]  }
 0x118   :  { %v1690_v30 = vpop.f32.mrb[3].mxu0  ;;  %v270_v32 = vadd.f32 %v1496_v22, %v254_v23  ;;  %v1710_v33 = vpop.f32.mrb[3].mxu1  ;;  %v271_v34 = vadd.f32 %v1497_v29, %v255_v26  ;;  %v1905_v22 = vld [vmem:[%s2629_s3 + $0x74] ss:$8 sps:$4 sm:$0xff]   ;;  %v1903_v23 = vld [vmem:[%s2629_s3 + $0x70] ss:$8 sps:$4 sm:$0xff]  }
 0x119   :  { %v1906_v30 = vld [vmem:[%s2630_s7] ss:$12 sps:$4 sm:$0xff]   ;;  %v1911_v33 = vld [vmem:[%s2630_s7 + $0x1c] ss:$12 sps:$4 sm:$0xff]  }
 0x11a   :  { %272 = vmax.xlane.f32.xlu0 %v270_v32 }
 0x11e   :  { %274 = vmax.xlane.f32.xlu0 %v271_v34 }
 0x1a7   :  { %v273_v35 = vpop.xlane.xlu0 %272 }
 0x1a8   :  { %v276_v36 = vsub.f32 %v270_v32, %v273_v35 }
 0x1aa   :  { %v278_v37 = vmul.f32 1.442695, %v276_v36  ;;  %v1909_v36 = vld [vmem:[%s2630_s7 + $0x18] ss:$12 sps:$4 sm:$0xff]  }
 0x1ab   :  { %v275_v38 = vpop.xlane.xlu0 %274 }
 0x1ac   :  { %1986 = vpow2.f32 %v278_v37  ;;  %v277_v39 = vsub.f32 %v271_v34, %v275_v38  ;;  %v1914_v37 = vld [vmem:[%s2630_s7 + $0x34] ss:$12 sps:$4 sm:$0xff]   ;;  %v1912_v38 = vld [vmem:[%s2630_s7 + $0x30] ss:$12 sps:$4 sm:$0xff]  }
 0x1ae   :  { %v280_v40 = vmul.f32 1.442695, %v277_v39  ;;  %v1917_v39 = vld [vmem:[%s2630_s7 + $0x4c] ss:$12 sps:$4 sm:$0xff]  }
 0x1b0   :  { %1988 = vpow2.f32 %v280_v40  ;;  %v1915_v40 = vld [vmem:[%s2630_s7 + $0x48] ss:$12 sps:$4 sm:$0xff]  }
 0x1b6   :  { %v1987_v41 = vpop.eup %1986 }
 0x1b7   :  { %282 = vadd.xlane.f32.xlu1 %v1987_v41 }
 0x1ba   :  { %v1989_v42 = vpop.eup %1988 }
 0x1bb   :  { %284 = vadd.xlane.f32.xlu1 %v1989_v42 }
 0x244   :  { %v283_v44 = vpop.xlane.xlu1 %282 }
 0x245   :  { %1990 = vrcp.f32 %v283_v44  ;;  %v1921_v44 = vld [vmem:[%s2630_s7 + $0x78] ss:$12 sps:$4 sm:$0xff]  }
 0x248   :  { %v285_v45 = vpop.xlane.xlu1 %284 }
 0x249   :  { %1992 = vrcp.f32 %v285_v45  ;;  %v1926_v45 = vld [vmem:[%s2630_s7 + $0x94] ss:$12 sps:$4 sm:$0xff]  }
 0x24f   :  { %v1991_v46 = vpop.eup %1990 }
 0x250   :  { %v288_v47 = vmul.f32 %v1991_v46, %v1987_v41  ;;  %v1920_v41 = vld [vmem:[%s2630_s7 + $0x64] ss:$12 sps:$4 sm:$0xff]  }
 0x251   :  { %v1924_v46 = vld [vmem:[%s2630_s7 + $0x90] ss:$12 sps:$4 sm:$0xff]  }
 0x252   :  { %v290_v49 = vpack.c.bf16 %v288_v47, %v288_v47  ;;  %v1929_v47 = vld [vmem:[%s2630_s7 + $0xac] ss:$12 sps:$4 sm:$0xff]  }
 0x253   :  { %v1993_v51 = vpop.eup %1992 }
 0x254   :  { %1728 = vmatmul.mubr.bf16.vlgmr.msra.gmra.mrb[4].mxu0 %v290_v49  ;;  %v289_v52 = vmul.f32 %v1993_v51, %v1989_v42  ;;  %v1918_v42 = vld [vmem:[%s2630_s7 + $0x60] ss:$12 sps:$4 sm:$0xff]   ;;  %v1932_v49 = vld [vmem:[%s2631_s6 + $0x4] ss:$12 sps:$4 sm:$0xff]   ;;  %v1935_v51 = vld [vmem:[%s2631_s6 + $0x1c] ss:$12 sps:$4 sm:$0xff]  }
 0x255   :  { %487 = vmatpush1.bf16.msra.mxu0 %v1858_v48  ;;  %518 = vmatprep.mubr.bf16.mxu0 %v2034_v54  ;;  %v1927_v48 = vld [vmem:[%s2630_s7 + $0xa8] ss:$12 sps:$4 sm:$0xff]  }
 0x256   :  { %v291_v55 = vpack.c.bf16 %v289_v52, %v289_v52  ;;  %488 = vmatprep.subr.bf16.mxu0 %v1863_v50  ;;  %v1930_v50 = vld [vmem:[%s2631_s6] ss:$12 sps:$4 sm:$0xff]   ;;  %v1933_v52 = vld [vmem:[%s2631_s6 + $0x18] ss:$12 sps:$4 sm:$0xff]  }
 0x258   :  { %1748 = vmatmul.mubr.bf16.vlgmr.msra.gmra.mrb[4].mxu1 %v291_v55  ;;  %v1936_v55 = vld [vmem:[%s2631_s6 + $0x30] ss:$12 sps:$4 sm:$0xff]  }
 0x259   :  { %489 = vmatpush1.bf16.msra.mxu0 %v1861_v53  ;;  %1767 = vmatprep.mubr.msk.bf16.mxu1 %vm2033_vm0, %v2032_v0  ;;  %v1938_v53 = vld [vmem:[%s2631_s6 + $0x34] ss:$12 sps:$4 sm:$0xff]  }
 0x25a   :  { %490 = vmatprep.subr.bf16.mxu0 %v1866_v56  ;;  %v1941_v56 = vld [vmem:[%s2631_s6 + $0x4c] ss:$12 sps:$4 sm:$0xff]  }
 0x25d   :  { %491 = vmatpush1.bf16.msra.mxu0 %v1864_v57  ;;  %v1944_v57 = vld [vmem:[%s2631_s6 + $0x64] ss:$12 sps:$4 sm:$0xff]  }
 0x25e   :  { %492 = vmatprep.subr.bf16.mxu0 %v1869_v58  ;;  %v1942_v58 = vld [vmem:[%s2631_s6 + $0x60] ss:$12 sps:$4 sm:$0xff]  }
 0x261   :  { %493 = vmatpush1.bf16.msra.mxu0 %v1867_v59  ;;  %v1947_v59 = vld [vmem:[%s2631_s6 + $0x7c] ss:$12 sps:$4 sm:$0xff]  }
 0x262   :  { %494 = vmatprep.subr.bf16.mxu0 %v1872_v60  ;;  %v1945_v60 = vld [vmem:[%s2631_s6 + $0x78] ss:$12 sps:$4 sm:$0xff]  }
 0x265   :  { %495 = vmatpush1.bf16.msra.mxu0 %v1870_v61  ;;  %v1950_v61 = vld [vmem:[%s2631_s6 + $0x94] ss:$12 sps:$4 sm:$0xff]  }
 0x266   :  { %496 = vmatprep.subr.bf16.mxu0 %v1875_v62  ;;  %v1948_v62 = vld [vmem:[%s2631_s6 + $0x90] ss:$12 sps:$4 sm:$0xff]  }
 0x269   :  { %497 = vmatpush1.bf16.msra.mxu0 %v1873_v63  ;;  %v1953_v63 = vld [vmem:[%s2631_s6 + $0xac] ss:$12 sps:$4 sm:$0xff]  }
 0x26a   :  { %498 = vmatprep.subr.bf16.mxu0 %v1878_v1  ;;  %v1951_v1 = vld [vmem:[%s2631_s6 + $0xa8] ss:$12 sps:$4 sm:$0xff]  }
 0x26d   :  { %499 = vmatpush1.bf16.msra.mxu0 %v1876_v2  ;;  %v1954_v2 = vld [vmem:[%s2632_s10] sm:$0xff]  }
 0x26e   :  { %500 = vmatprep.subr.bf16.mxu0 %v1881_v3  ;;  %1752 = vmatpush3.bf16.msra.mxu1 %v1954_v2  ;;  %v1955_v3 = vld [vmem:[%s2632_s10 + $0x8] sm:$0xff]  }
 0x26f   :  { %1753 = vmatprep.subr.bf16.mxu1 %v2032_v0  ;;  %v1970_v2 = vld [vmem:[%s2630_s7 + $0x8] ss:$12 sps:$4 sm:$0xff]  }
 0x271   :  { %501 = vmatpush1.bf16.msra.mxu0 %v1879_v4  ;;  %v1956_v4 = vld [vmem:[%s2632_s10 + $0x10] sm:$0xff]  }
 0x272   :  { %609 = vmatprep.subr.bf16.mxu0 %v1884_v5  ;;  %1754 = vmatpush3.bf16.msra.mxu1 %v1955_v3  ;;  %v1957_v5 = vld [vmem:[%s2632_s10 + $0x18] sm:$0xff]  }
 0x273   :  { %1755 = vmatprep.subr.bf16.mxu1 %v2032_v0 }
 0x274   :  { %519 = vmatmul.mubr.bf16.vlgmr.msra.gmra.mrb[8].mxu0 %v2265_v6 }
 0x275   :  { %610 = vmatpush1.bf16.msra.mxu0 %v1882_v7  ;;  %641 = vmatprep.mubr.bf16.mxu0 %v2034_v54  ;;  %v1958_v7 = vld [vmem:[%s2632_s10 + $0x20] sm:$0xff]  }
 0x276   :  { %611 = vmatprep.subr.bf16.mxu0 %v1887_v8  ;;  %1756 = vmatpush3.bf16.msra.mxu1 %v1956_v4  ;;  %v1959_v8 = vld [vmem:[%s2632_s10 + $0x28] sm:$0xff]  }
 0x277   :  { %1757 = vmatprep.subr.bf16.mxu1 %v2032_v0 }
 0x279   :  { %612 = vmatpush1.bf16.msra.mxu0 %v1885_v9  ;;  %v1960_v9 = vld [vmem:[%s2632_s10 + $0x30] sm:$0xff]  }
 0x27a   :  { %613 = vmatprep.subr.bf16.mxu0 %v1890_v10  ;;  %1758 = vmatpush3.bf16.msra.mxu1 %v1957_v5  ;;  %v1961_v10 = vld [vmem:[%s2632_s10 + $0x38] sm:$0xff]  }
 0x27b   :  { %1759 = vmatprep.subr.bf16.mxu1 %v2032_v0 }
 0x27d   :  { %614 = vmatpush1.bf16.msra.mxu0 %v1888_v11  ;;  %v654_v11 = vlaneseq }
 0x27e   :  { %615 = vmatprep.subr.bf16.mxu0 %v1893_v12  ;;  %1760 = vmatpush3.bf16.msra.mxu1 %v1958_v7 }
 0x27f   :  { %1761 = vmatprep.subr.bf16.mxu1 %v2032_v0  ;;  %v2455_v12 = vshrl.u32 %v654_v11, 7 }
 0x281   :  { %616 = vmatpush1.bf16.msra.mxu0 %v1891_v13  ;;  %v656_v13 = vsub.s32 0, %v2455_v12 }
 0x282   :  { %617 = vmatprep.subr.bf16.mxu0 %v1896_v14  ;;  %1762 = vmatpush3.bf16.msra.mxu1 %v1959_v8  ;;  %v652_v14 = vld [vmem:[%s2634_s5] sm:$0x3] }
 0x283   :  { %1763 = vmatprep.subr.bf16.mxu1 %v2032_v0 }
 0x285   :  { %618 = vmatpush1.bf16.msra.mxu0 %v1894_v15  ;;  %v660_v15 = vsub.s32 1, %v2455_v12 }
 0x286   :  { %619 = vmatprep.subr.bf16.mxu0 %v1899_v16  ;;  %1764 = vmatpush3.bf16.msra.mxu1 %v1960_v9  ;;  %v657_v16 = vrot.slane %v652_v14, %v656_v13 }
 0x287   :  { %1765 = vmatprep.subr.bf16.mxu1 %v2032_v0 }
 0x289   :  { %620 = vmatpush1.bf16.msra.mxu0 %v1897_v19  ;;  %v661_v19 = vrot.slane %v652_v14, %v660_v15  ;;  %v1973_v14 = vld [vmem:[%s2630_s7 + $0x50] ss:$12 sps:$4 sm:$0xff]  }
 0x28a   :  { %621 = vmatprep.subr.bf16.mxu0 %v1902_v20  ;;  %1766 = vmatpush3.bf16.msra.mxu1 %v1961_v10  ;;  %v1971_v10 = vld [vmem:[%s2630_s7 + $0x20] ss:$12 sps:$4 sm:$0xff]  }
 0x28b   :  { %1771 = vmatprep.subr.bf16.mxu1 %v2032_v0 }
 0x28d   :  { %622 = vmatpush1.bf16.msra.mxu0 %v1900_v21 }
 0x28e   :  { %623 = vmatprep.subr.bf16.mxu0 %v1905_v22 }
 0x291   :  { %624 = vmatpush1.bf16.msra.mxu0 %v1903_v23 }
 0x292   :  { %1111 = vmatprep.subr.bf16.mxu0 %v1908_v24 }
 0x327   :  { %v2317_v25 = vpop.f32.mrb[4].mxu0 }
 0x328   :  { %v1729_v26 = vpop.f32.mrb[5].mxu0 }
 0x329   :  { %v329_v27 = vpop.f32.mrb[6].mxu0 }
 0x32a   :  { %v1730_v28 = vpop.f32.mrb[7].mxu0 }
 0x32b   :  { %v2319_v29 = vpop.f32.mrb[4].mxu1 }
 0x32c   :  { %v2326_v31 = vpack.c.bf16 %v2319_v29, %v2317_v25  ;;  %v1749_v32 = vpop.f32.mrb[5].mxu1 }
 0x32d   :  { %v369_v34 = vpop.f32.mrb[6].mxu1 }
 0x32e   :  { %v1750_v35 = vpop.f32.mrb[7].mxu1  ;;  %642 = vmatmul.mubr.bf16.vlgmr.msra.gmra.mrb[8].mxu0 %v2326_v31 }
 0x32f   :  { %1112 = vmatpush1.bf16.msra.mxu0 %v1906_v30  ;;  %1143 = vmatprep.mubr.bf16.mxu0 %v2034_v54 }
 0x330   :  { %1113 = vmatprep.subr.bf16.mxu0 %v1911_v33 }
 0x333   :  { %1114 = vmatpush1.bf16.msra.mxu0 %v1909_v36 }
 0x334   :  { %1115 = vmatprep.subr.bf16.mxu0 %v1914_v37 }
 0x337   :  { %1116 = vmatpush1.bf16.msra.mxu0 %v1912_v38 }
 0x338   :  { %1117 = vmatprep.subr.bf16.mxu0 %v1917_v39 }
 0x33b   :  { %1118 = vmatpush1.bf16.msra.mxu0 %v1915_v40 }
 0x33c   :  { %1119 = vmatprep.subr.bf16.mxu0 %v1920_v41 }
 0x33f   :  { %1120 = vmatpush1.bf16.msra.mxu0 %v1918_v42 }
 0x340   :  { %1121 = vmatprep.subr.bf16.mxu0 %v1923_v43 }
 0x343   :  { %1122 = vmatpush1.bf16.msra.mxu0 %v1921_v44 }
 0x344   :  { %1123 = vmatprep.subr.bf16.mxu0 %v1926_v45 }
 0x347   :  { %1124 = vmatpush1.bf16.msra.mxu0 %v1924_v46 }
 0x348   :  { %1125 = vmatprep.subr.bf16.mxu0 %v1929_v47 }
 0x34b   :  { %1126 = vmatpush1.bf16.msra.mxu0 %v1927_v48 }
 0x34c   :  { %1323 = vmatprep.subr.bf16.mxu0 %v1932_v49 }
 0x34e   :  { %1144 = vmatmul.mubr.bf16.vlgmr.msra.gmra.mrb[12].mxu0 %v2265_v6 }
 0x34f   :  { %1324 = vmatpush1.bf16.msra.mxu0 %v1930_v50  ;;  %1355 = vmatprep.mubr.bf16.mxu0 %v2034_v54  ;;  %v1939_v54 = vld [vmem:[%s2631_s6 + $0x48] ss:$12 sps:$4 sm:$0xff]  }
 0x350   :  { %1325 = vmatprep.subr.bf16.mxu0 %v1935_v51  ;;  %v1962_v51 = vld [vmem:[%s2633_s9] sm:$0xff]  }
 0x353   :  { %1326 = vmatpush1.bf16.msra.mxu0 %v1933_v52 }
 0x354   :  { %1327 = vmatprep.subr.bf16.mxu0 %v1938_v53 }
 0x357   :  { %1328 = vmatpush1.bf16.msra.mxu0 %v1936_v55  ;;  %v1963_v55 = vld [vmem:[%s2633_s9 + $0x8] sm:$0xff]  }
 0x358   :  { %1329 = vmatprep.subr.bf16.mxu0 %v1941_v56  ;;  %v1966_v56 = vld [vmem:[%s2633_s9 + $0x20] sm:$0xff]  }
 0x35b   :  { %1330 = vmatpush1.bf16.msra.mxu0 %v1939_v54  ;;  %v1967_v54 = vld [vmem:[%s2633_s9 + $0x28] sm:$0xff]  }
 0x35c   :  { %1331 = vmatprep.subr.bf16.mxu0 %v1944_v57  ;;  %v1968_v57 = vld [vmem:[%s2633_s9 + $0x30] sm:$0xff]  }
 0x35f   :  { %1332 = vmatpush1.bf16.msra.mxu0 %v1942_v58  ;;  %v2502_v58 = vld [vmem:[%s2635_s8] sm:$0x7] }
 0x360   :  { %1333 = vmatprep.subr.bf16.mxu0 %v1947_v59  ;;  %v1412_v59 = vrot.slane %v2502_v58, %v656_v13  ;;  %v1972_v13 = vld [vmem:[%s2630_s7 + $0x38] ss:$12 sps:$4 sm:$0xff]  }
 0x363   :  { %1334 = vmatpush1.bf16.msra.mxu0 %v1945_v60  ;;  %v1969_v60 = vld [vmem:[%s2633_s9 + $0x38] sm:$0xff]  }
 0x364   :  { %1335 = vmatprep.subr.bf16.mxu0 %v1950_v61  ;;  %v1416_v61 = vrot.slane %v2502_v58, %v660_v15  ;;  %v1974_v15 = vld [vmem:[%s2630_s7 + $0x68] ss:$12 sps:$4 sm:$0xff]  }
 0x367   :  { %1336 = vmatpush1.bf16.msra.mxu0 %v1948_v62 }
 0x368   :  { %1337 = vmatprep.subr.bf16.mxu0 %v1953_v63 }
 0x36b   :  { %1338 = vmatpush1.bf16.msra.mxu0 %v1951_v1 }
 0x36e   :  { %1356 = vmatmul.mubr.bf16.vlgmr.msra.gmra.mrb[12].mxu0 %v2326_v31 }
 0x401   :  { %v643_v20 = vpop.f32.mrb[8].mxu0 }
 0x402   :  { %v664_v21 = vadd.f32 %v657_v16, %v643_v20  ;;  %v645_v22 = vpop.f32.mrb[9].mxu0  ;;  %v1977_v20 = vld [vmem:[%s2630_s7 + $0xb0] ss:$12 sps:$4 sm:$0xff]  }
 0x403   :  { %v665_v23 = vadd.f32 %v661_v19, %v645_v22  ;;  %v647_v24 = vpop.f32.mrb[10].mxu0  ;;  %v1979_v22 = vld [vmem:[%s2631_s6 + $0x20] ss:$12 sps:$4 sm:$0xff]  }
 0x404   :  { %v1530_v26 = vmul.f32 -1.442695, %v664_v21  ;;  %v666_v27 = vadd.f32 %v657_v16, %v647_v24  ;;  %v649_v28 = vpop.f32.mrb[11].mxu0  ;;  %v1975_v16 = vld [vmem:[%s2630_s7 + $0x80] ss:$12 sps:$4 sm:$0xff]  }
 0x405   :  { %v1532_v30 = vmul.f32 -1.442695, %v665_v23  ;;  %v667_v32 = vadd.f32 %v661_v19, %v649_v28  ;;  %v1976_v19 = vld [vmem:[%s2630_s7 + $0x98] ss:$12 sps:$4 sm:$0xff]   ;;  %v1978_v21 = vld [vmem:[%s2631_s6 + $0x8] ss:$12 sps:$4 sm:$0xff]  }
 0x406   :  { %1994 = vpow2.f32 %v1530_v26  ;;  %v1531_v33 = vmul.f32 -1.442695, %v666_v27  ;;  %v1980_v23 = vld [vmem:[%s2631_s6 + $0x38] ss:$12 sps:$4 sm:$0xff]   ;;  %v1982_v24 = vld [vmem:[%s2631_s6 + $0x68] ss:$12 sps:$4 sm:$0xff]  }
 0x407   :  { %1996 = vpow2.f32 %v1532_v30  ;;  %v1533_v34 = vmul.f32 -1.442695, %v667_v32  ;;  %v1983_v26 = vld [vmem:[%s2631_s6 + $0x80] ss:$12 sps:$4 sm:$0xff]   ;;  %v1984_v27 = vld [vmem:[%s2631_s6 + $0x98] ss:$12 sps:$4 sm:$0xff]  }
 0x408   :  { %1998 = vpow2.f32 %v1531_v33  ;;  %v1985_v28 = vld [vmem:[%s2631_s6 + $0xb0] ss:$12 sps:$4 sm:$0xff]  }
 0x409   :  { %2000 = vpow2.f32 %v1533_v34 }
 0x410   :  { %v1995_v35 = vpop.eup %1994 }
 0x411   :  { %v1997_v36 = vpop.eup %1996  ;;  %v674_v37 = vadd.f32 1.0, %v1995_v35 }
 0x412   :  { %v1999_v38 = vpop.eup %1998  ;;  %v686_v39 = vadd.f32 1.0, %v1997_v36 }
 0x413   :  { %v2001_v40 = vpop.eup %2000  ;;  %2002 = vrcp.f32 %v674_v37  ;;  %v675_v41 = vadd.f32 1.0, %v1999_v38 }
 0x414   :  { %2004 = vrcp.f32 %v686_v39  ;;  %v687_v42 = vadd.f32 1.0, %v2001_v40 }
 0x415   :  { %2006 = vrcp.f32 %v675_v41 }
 0x416   :  { %2008 = vrcp.f32 %v687_v42 }
 0x41d   :  { %v2003_v43 = vpop.eup %2002 }
 0x41e   :  { %v2005_v44 = vpop.eup %2004  ;;  %v692_v45 = vmul.f32 %v2003_v43, %v2317_v25 }
 0x41f   :  { %v2007_v46 = vpop.eup %2006  ;;  %v711_v49 = vmul.f32 %v2005_v44, %v2171_v17  ;;  %v1964_v17 = vld [vmem:[%s2633_s9 + $0x10] sm:$0xff]  }
 0x420   :  { %v2009_v47 = vpop.eup %2008  ;;  %v693_v48 = vmul.f32 %v2007_v46, %v2319_v29 }
 0x421   :  { %v712_v50 = vmul.f32 %v2009_v47, %v2176_v18  ;;  %v1965_v18 = vld [vmem:[%s2633_s9 + $0x18] sm:$0xff]  }
 0x422   :  { %v694_v52 = vpack.c.bf16 %v693_v48, %v692_v45  ;;  %v1419_v45 = vsub.s32 2, %v2455_v12 }
 0x423   :  { %v713_v53 = vpack.c.bf16 %v712_v50, %v711_v49 }
 0x425   :  { %1768 = vmatmul.mubr.bf16.vlgmr.msra.gmra.mrb[8].mxu1 %v713_v53 }
 0x426   :  { %1772 = vmatpush3.bf16.msra.mxu1 %v1962_v51  ;;  %1787 = vmatprep.mubr.msk.bf16.mxu1 %vm2033_vm0, %v2032_v0 }
 0x427   :  { %1773 = vmatprep.subr.bf16.mxu1 %v2032_v0 }
 0x42a   :  { %1774 = vmatpush3.bf16.msra.mxu1 %v1963_v55 }
 0x42b   :  { %1775 = vmatprep.subr.bf16.mxu1 %v2032_v0 }
 0x42e   :  { %1776 = vmatpush3.bf16.msra.mxu1 %v1964_v17 }
 0x42f   :  { %1777 = vmatprep.subr.bf16.mxu1 %v2032_v0 }
 0x432   :  { %1778 = vmatpush3.bf16.msra.mxu1 %v1965_v18 }
 0x433   :  { %1779 = vmatprep.subr.bf16.mxu1 %v2032_v0 }
 0x436   :  { %1780 = vmatpush3.bf16.msra.mxu1 %v1966_v56 }
 0x437   :  { %1781 = vmatprep.subr.bf16.mxu1 %v2032_v0 }
 0x43a   :  { %1782 = vmatpush3.bf16.msra.mxu1 %v1967_v54 }
 0x43b   :  { %1783 = vmatprep.subr.bf16.mxu1 %v2032_v0 }
 0x43e   :  { %1784 = vmatpush3.bf16.msra.mxu1 %v1968_v57 }
 0x43f   :  { %1785 = vmatprep.subr.bf16.mxu1 %v2032_v0 }
 0x441   :  { %v1357_v62 = vpop.f32.mrb[12].mxu0 }
 0x442   :  { %v2514_v63 = vadd.f32 %v1412_v59, %v1357_v62  ;;  %1786 = vmatpush3.bf16.msra.mxu1 %v1969_v60  ;;  %v1359_v1 = vpop.f32.mrb[13].mxu0 }
 0x443   :  { %v2519_v3 = vadd.f32 %v1416_v61, %v1359_v1  ;;  %v1361_v4 = vpop.f32.mrb[14].mxu0  ;;  %1791 = vmatprep.subr.bf16.mxu1 %v2032_v0 }
 0x444   :  { %v2522_v5 = vadd.f32 %v1412_v59, %v1361_v4  ;;  %v1363_v7 = vpop.f32.mrb[15].mxu0 }
 0x445   :  { %v1430_v8 = vmax.f32 %v2514_v63, %v2519_v3  ;;  %v2526_v9 = vadd.f32 %v1416_v61, %v1363_v7  ;;  %1788 = vmatmul.mubr.bf16.vlgmr.msra.gmra.mrb[12].mxu1 %v694_v52 }
 0x446   :  { %1792 = vmatpush3.bf16.msra.mxu1 %v1970_v2  ;;  %1807 = vmatprep.mubr.msk.bf16.mxu1 %vm2033_vm0, %v2032_v0 }
 0x447   :  { %v1431_v11 = vmax.f32 %v2522_v5, %v2526_v9  ;;  %1793 = vmatprep.subr.bf16.mxu1 %v2032_v0 }
 0x44a   :  { %1794 = vmatpush3.bf16.msra.mxu1 %v1971_v10 }
 0x44b   :  { %1795 = vmatprep.subr.bf16.mxu1 %v2032_v0 }
 0x44e   :  { %1796 = vmatpush3.bf16.msra.mxu1 %v1972_v13 }
 0x44f   :  { %1797 = vmatprep.subr.bf16.mxu1 %v2032_v0 }
 0x452   :  { %1798 = vmatpush3.bf16.msra.mxu1 %v1973_v14 }
 0x453   :  { %1799 = vmatprep.subr.bf16.mxu1 %v2032_v0 }
 0x456   :  { %1800 = vmatpush3.bf16.msra.mxu1 %v1974_v15 }
 0x457   :  { %1801 = vmatprep.subr.bf16.mxu1 %v2032_v0 }
 0x45a   :  { %1802 = vmatpush3.bf16.msra.mxu1 %v1975_v16 }
 0x45b   :  { %1803 = vmatprep.subr.bf16.mxu1 %v2032_v0 }
 0x45e   :  { %1804 = vmatpush3.bf16.msra.mxu1 %v1976_v19 }
 0x45f   :  { %1805 = vmatprep.subr.bf16.mxu1 %v2032_v0 }
 0x462   :  { %1806 = vmatpush3.bf16.msra.mxu1 %v1977_v20 }
 0x463   :  { %1811 = vmatprep.subr.bf16.mxu1 %v2032_v0 }
 0x465   :  { %1808 = vmatmul.mubr.bf16.vlgmr.msra.gmra.mrb[16].mxu1 %v2265_v6  ;;  %v1981_v6 = vld [vmem:[%s2631_s6 + $0x50] ss:$12 sps:$4 sm:$0xff]  }
 0x466   :  { %1812 = vmatpush3.bf16.msra.mxu1 %v1978_v21  ;;  %1827 = vmatprep.mubr.msk.bf16.mxu1 %vm2033_vm0, %v2032_v0 }
 0x467   :  { %1813 = vmatprep.subr.bf16.mxu1 %v2032_v0 }
 0x46a   :  { %1814 = vmatpush3.bf16.msra.mxu1 %v1979_v22 }
 0x46b   :  { %1815 = vmatprep.subr.bf16.mxu1 %v2032_v0 }
 0x46e   :  { %1816 = vmatpush3.bf16.msra.mxu1 %v1980_v23 }
 0x46f   :  { %1817 = vmatprep.subr.bf16.mxu1 %v2032_v0 }
 0x472   :  { %1818 = vmatpush3.bf16.msra.mxu1 %v1981_v6 }
 0x473   :  { %1819 = vmatprep.subr.bf16.mxu1 %v2032_v0 }
 0x476   :  { %1820 = vmatpush3.bf16.msra.mxu1 %v1982_v24  ;;  %v2030_v24 = vld [vmem:[%s2626_s0] sm:$0xff] }
 0x477   :  { %1821 = vmatprep.subr.bf16.mxu1 %v2032_v0 }
 0x47a   :  { %1822 = vmatpush3.bf16.msra.mxu1 %v1983_v26 }
 0x47b   :  { %1823 = vmatprep.subr.bf16.mxu1 %v2032_v0 }
 0x47e   :  { %1824 = vmatpush3.bf16.msra.mxu1 %v1984_v27 }
 0x47f   :  { %1825 = vmatprep.subr.bf16.mxu1 %v2032_v0  ;;  %v1420_v0 = vrot.slane %v2502_v58, %v1419_v45 }
 0x482   :  { %1826 = vmatpush3.bf16.msra.mxu1 %v1985_v28 }
 0x485   :  { %1828 = vmatmul.mubr.bf16.vlgmr.msra.gmra.mrb[20].mxu1 %v2326_v31 }
 0x4f8   :  { %v812_v30 = vpop.f32.mrb[8].mxu1 }
 0x4f9   :  { %v1769_v32 = vpop.f32.mrb[9].mxu1 }
 0x4fa   :  { %v815_v33 = vpop.f32.mrb[10].mxu1 }
 0x4fb   :  { %v1770_v34 = vpop.f32.mrb[11].mxu1 }
 0x518   :  { %v901_v35 = vpop.f32.mrb[12].mxu1 }
 0x519   :  { %v902_v36 = vadd.f32 %v901_v35, %v812_v30  ;;  %v1789_v37 = vpop.f32.mrb[13].mxu1 }
 0x51a   :  { %v904_v38 = vpop.f32.mrb[14].mxu1 }
 0x51b   :  { %v905_v39 = vadd.f32 %v904_v38, %v815_v33  ;;  %v1790_v40 = vpop.f32.mrb[15].mxu1 }
 0x538   :  { %v1188_v41 = vpop.f32.mrb[16].mxu1 }
 0x539   :  { %v1809_v42 = vpop.f32.mrb[17].mxu1 }
 0x53a   :  { %v1191_v43 = vpop.f32.mrb[18].mxu1 }
 0x53b   :  { %v1810_v44 = vpop.f32.mrb[19].mxu1 }
 0x558   :  { %v1400_v46 = vpop.f32.mrb[20].mxu1 }
 0x559   :  { %v1401_v31 = vadd.f32 %v1400_v46, %v1188_v41  ;;  %v1829_v47 = vpop.f32.mrb[21].mxu1 }
 0x55a   :  { %v1403_v48 = vpop.f32.mrb[22].mxu1 }
 0x55b   :  { %v1426_v49 = vadd.f32 %v1420_v0, %v1401_v31  ;;  %v1404_v50 = vadd.f32 %v1403_v48, %v1191_v43  ;;  %v1830_v51 = vpop.f32.mrb[23].mxu1 }
 0x55d   :  { %v1432_v52 = vmax.f32 %v1430_v8, %v1426_v49  ;;  %v1429_v53 = vadd.f32 %v1420_v0, %v1404_v50 }
 0x55f   :  { %v1434_v55 = vsub.f32 %v2514_v63, %v1432_v52  ;;  %v1440_v17 = vsub.f32 %v2519_v3, %v1432_v52  ;;  %v1446_v18 = vsub.f32 %v1426_v49, %v1432_v52  ;;  %v1433_v12 = vmax.f32 %v1431_v11, %v1429_v53  ;;  %v1550_v3 = vld [vmem:[%s2636_s11] ss:$0 sm:$0xff] }
 0x560   :  { %v916_v14 = vadd.f32 %v1550_v3, %v905_v39 }
 0x561   :  { %v1436_v56 = vmul.f32 1.442695, %v1434_v55  ;;  %v1442_v54 = vmul.f32 1.442695, %v1440_v17  ;;  %v1448_v57 = vmul.f32 1.442695, %v1446_v18  ;;  %v1435_v58 = vsub.f32 %v2522_v5, %v1433_v12 }
 0x562   :  { %v1441_v59 = vsub.f32 %v2526_v9, %v1433_v12  ;;  %v1447_v60 = vsub.f32 %v1429_v53, %v1433_v12  ;;  %v915_v9 = vadd.f32 %v1550_v3, %v902_v36  ;;  %v2031_v36 = vld [vmem:[%s2626_s0 + $0x8] sm:$0xff] }
 0x563   :  { %2010 = vpow2.f32 %v1436_v56  ;;  %v1438_v61 = vmul.f32 1.442695, %v1435_v58 }
 0x564   :  { %2012 = vpow2.f32 %v1442_v54  ;;  %v1444_v62 = vmul.f32 1.442695, %v1441_v59  ;;  %v1450_v63 = vmul.f32 1.442695, %v1447_v60 }
 0x565   :  { %2014 = vpow2.f32 %v1448_v57 }
 0x566   :  { %2016 = vpow2.f32 %v1438_v61 }
 0x567   :  { %2018 = vpow2.f32 %v1444_v62 }
 0x568   :  { %2020 = vpow2.f32 %v1450_v63 }
 0x56d   :  { %v2011_v1 = vpop.eup %2010 }
 0x56e   :  { %v2013_v2 = vpop.eup %2012 }
 0x56f   :  { %v2015_v4 = vpop.eup %2014  ;;  %v1452_v5 = vadd.f32 %v2013_v2, %v2011_v1 }
 0x570   :  { %v2017_v7 = vpop.eup %2016 }
 0x571   :  { %v2019_v8 = vpop.eup %2018  ;;  %v1454_v10 = vadd.f32 %v2015_v4, %v1452_v5 }
 0x572   :  { %v1453_v11 = vadd.f32 %v2019_v8, %v2017_v7  ;;  %v2021_v13 = vpop.eup %2020 }
 0x573   :  { %2022 = vrcp.f32 %v1454_v10 }
 0x574   :  { %v1455_v15 = vadd.f32 %v2021_v13, %v1453_v11  ;;  %2024 = vtanh.f32 %v915_v9 }
 0x576   :  { %2026 = vrcp.f32 %v1455_v15 }
 0x577   :  { %2028 = vtanh.f32 %v916_v14 }
 0x57d   :  { %v2023_v16 = vpop.eup %2022 }
 0x57e   :  { %v1458_v19 = vmul.f32 %v2023_v16, %v2011_v1  ;;  %v1462_v20 = vmul.f32 %v2023_v16, %v2013_v2  ;;  %v1468_v21 = vmul.f32 %v2023_v16, %v2015_v4  ;;  %v2025_v22 = vpop.eup %2024 }
 0x580   :  { %v2027_v23 = vpop.eup %2026  ;;  %v1460_v6 = vmul.f32 %v1458_v19, %v2317_v25  ;;  %v1464_v26 = vmul.f32 %v2030_v24, %v1462_v20  ;;  %v1470_v27 = vmul.f32 %v2025_v22, %v1468_v21 }
 0x581   :  { %v1459_v28 = vmul.f32 %v2027_v23, %v2017_v7  ;;  %v1463_v30 = vmul.f32 %v2027_v23, %v2019_v8  ;;  %v1469_v32 = vmul.f32 %v2027_v23, %v2021_v13  ;;  %v2029_v33 = vpop.eup %2028 }
 0x582   :  { %v1466_v34 = vadd.f32 %v1464_v26, %v1460_v6 }
 0x583   :  { %v1461_v35 = vmul.f32 %v1459_v28, %v2319_v29  ;;  %v1465_v37 = vmul.f32 %v2031_v36, %v1463_v30  ;;  %v1471_v38 = vmul.f32 %v2029_v33, %v1469_v32 }
 0x584   :  { %v1472_v25 = vadd.f32 %v1470_v27, %v1466_v34 }
 0x585   :  { %v1467_v39 = vadd.f32 %v1465_v37, %v1461_v35 }
 0x586   :  { %1474 = vst [vmem:[%s2637_s12] sm:$0xff] %v1472_v25 }
 0x587   :  { %v1473_v40 = vadd.f32 %v1471_v38, %v1467_v39 }
 0x589   :  { %1475 = vst [vmem:[%s2637_s12 + $0x8] sm:$0xff] %v1473_v40 }

</bundles_post_ra>
